<compile_context>
chip_gen: v6e
topology: v6e:2x2x1
jax: 0.10.0
libtpu: 0.0.40
codegen_flags: <defaults>
</compile_context>

<pallas_src>
import functools

import jax
import jax.numpy as jnp
from jax.experimental import pallas as pl
from jax.experimental.pallas import tpu as pltpu


def _nce_loss_kernel(x_ref, o_ref, m_sc, s_sc, p_sc, *, n_classes, tile_c, n_ct):
    """One (batch-tile, class-tile) grid step of the streaming logsumexp."""
    j = pl.program_id(1)  # class-tile index (reduction axis, last in grid)

    x = x_ref[...].astype(jnp.float32)  # (TB, TC): f32 math on all chips
    tb, tc = x.shape

    # Mask class lanes past the true number of classes (partial last tile).
    col = jax.lax.broadcasted_iota(jnp.int32, (tb, tc), 1) + j * tile_c
    x = jnp.where(col < n_classes, x, -jnp.inf)

    @pl.when(j == 0)
    def _init():
        m_sc[...] = jnp.full((tb, 1), -jnp.inf, jnp.float32)
        s_sc[...] = jnp.zeros((tb, 1), jnp.float32)
        p_sc[...] = x[:, 0:1]  # positive (class-0) logit lives in the j==0 tile

    # Online logsumexp update.
    m_prev = m_sc[...]
    m_new = jnp.maximum(m_prev, jnp.max(x, axis=-1, keepdims=True))
    alpha = jnp.exp(m_prev - m_new)
    s_sc[...] = alpha * s_sc[...] + jnp.sum(jnp.exp(x - m_new), axis=-1,
                                            keepdims=True)
    m_sc[...] = m_new

    @pl.when(j == n_ct - 1)
    def _finalize():
        lse = m_sc[...] + jnp.log(s_sc[...])
        o_ref[...] = lse - p_sc[...]  # per-row cross-entropy with target 0


def nce_softmax_loss(x, *, reduction="mean", tile_b=None, tile_c=None):
    """info-NCE loss: cross-entropy of logits `x` against label 0 per row."""
    B = x.shape[0]
    # Robust equivalent of torch's x.squeeze() for MoCo logits [B, C, 1, ...]
    # (also safe for B == 1, unlike squeezing every singleton dim).
    x2d = jnp.reshape(x, (B, -1))
    C = x2d.shape[1]

    # ---- tile-size selection -------------------------------------------------
    # Class tile: whole row if small, else 2048-lane chunks (multiple of 128)
    # streamed through the online logsumexp.
    if tile_c is None:
        tile_c = C if C <= 2048 else 2048
    # Batch tile: multiple of 8 sublanes; keep each f32 block <= ~4 MiB so
    # 2x double-buffered inputs stay well inside scoped VMEM on v5e/v6e/v7x.
    if tile_b is None:
        max_rows = max(8, (4 * 1024 * 1024) // (4 * tile_c))
        max_rows = (max_rows // 8) * 8
        tile_b = min(512, max_rows)
    if tile_b >= B:
        tile_b = B  # single full-extent batch block (always a legal block dim)
    else:
        tile_b = max(8, (tile_b // 8) * 8)  # keep (8, 128) divisibility

    n_bt = pl.cdiv(B, tile_b)
    n_ct = pl.cdiv(C, tile_c)
    b_pad = n_bt * tile_b

    itemsize = jnp.dtype(x2d.dtype).itemsize
    cost = pl.CostEstimate(
        flops=3 * B * C,            # max / sub / add per element (roughly)
        transcendentals=B * C,      # exp per element (+ B logs, negligible)
        bytes_accessed=B * C * itemsize + b_pad * 4,
    )

    kernel = functools.partial(_nce_loss_kernel,
                               n_classes=C, tile_c=tile_c, n_ct=n_ct)

    per_row = pl.pallas_call(
        kernel,
        out_shape=jax.ShapeDtypeStruct((b_pad, 1), jnp.float32),
        grid_spec=pltpu.PrefetchScalarGridSpec(
            num_scalar_prefetch=0,
            grid=(n_bt, n_ct),
            in_specs=[pl.BlockSpec((tile_b, tile_c), lambda i, j: (i, j))],
            out_specs=pl.BlockSpec((tile_b, 1), lambda i, j: (i, 0)),
            scratch_shapes=[pltpu.VMEM((tile_b, 1), jnp.float32)] * 3,
        ),
        compiler_params=pltpu.CompilerParams(
            dimension_semantics=("parallel", "arbitrary")),
        cost_estimate=cost,
    )(x2d)

    losses = per_row[:B, 0]
    if reduction == "mean":
        return jnp.mean(losses)
    if reduction == "sum":
        return jnp.sum(losses)
    return losses  # reduction == 'none'


def _reference(x):
    B = x.shape[0]
    x2d = jnp.reshape(x, (B, -1)).astype(jnp.float32)
    lse = jax.scipy.special.logsumexp(x2d, axis=-1)
    return jnp.mean(lse - x2d[:, 0])


if __name__ == "__main__":
    key = jax.random.PRNGKey(0)

    # MoCo-style logits: [bsz, 1 + n_neg, 1]; class 0 is the positive pair.
    bsz, n_neg = 8, 16
    x = jax.random.normal(key, (bsz, 1 + n_neg, 1), dtype=jnp.float32)
    loss = nce_softmax_loss(x)
    jax.block_until_ready(loss)
    ref = _reference(x)
    assert jnp.allclose(loss, ref, atol=1e-5, rtol=1e-5), (loss, ref)

    # Exercise the tiled / masked path (partial batch tile + partial class tile,
    # online logsumexp across multiple class tiles).
    k2 = jax.random.split(key)[0]
    x2 = jax.random.normal(k2, (13, 300), dtype=jnp.float32)
    loss2 = nce_softmax_loss(x2, tile_b=8, tile_c=128)
    jax.block_until_ready(loss2)
    ref2 = _reference(x2)
    assert jnp.allclose(loss2, ref2, atol=1e-5, rtol=1e-5), (loss2, ref2)

    print("KERNEL_OK")
</pallas_src>

<mosaic_0001>
module attributes {stable_mosaic.version = 11 : i64} {
  func.func @_nce_loss_kernel(%arg0: i32, %arg1: i32, %arg2: memref<8x17xf32, #tpu.memory_space<vmem>>, %arg3: memref<8x1xf32, #tpu.memory_space<vmem>>, %arg4: memref<8x1xf32, #tpu.memory_space<vmem>>, %arg5: memref<8x1xf32, #tpu.memory_space<vmem>>, %arg6: memref<8x1xf32, #tpu.memory_space<vmem>>) attributes {dimension_semantics = [#tpu.dimension_semantics<parallel>, #tpu.dimension_semantics<arbitrary>], iteration_bounds = array<i64: 1, 1>, scalar_prefetch = 0 : i64, scratch_operands = 3 : i64, tpu.core_type = #tpu.core_type<tc>, window_params = [{transform_indices = @transform_0, window_bounds = array<i64: 8, 17>}, {transform_indices = @transform_1, window_bounds = array<i64: 8, 1>}]} {
    %c0 = arith.constant 0 : index
    %c0_0 = arith.constant 0 : index
    %0 = vector.load %arg2[%c0, %c0_0] : memref<8x17xf32, #tpu.memory_space<vmem>>, vector<8x17xf32>
    %1 = tpu.iota {dimensions = array<i32: 1>} : vector<8x17xi32>
    %c17_i32 = arith.constant 17 : i32
    %2 = arith.muli %arg1, %c17_i32 : i32
    %3 = vector.broadcast %2 : i32 to vector<8x17xi32>
    %4 = arith.addi %1, %3 : vector<8x17xi32>
    %c17_i32_1 = arith.constant 17 : i32
    %5 = vector.broadcast %c17_i32_1 : i32 to vector<8x17xi32>
    %6 = arith.cmpi slt, %4, %5 : vector<8x17xi32>
    %cst = arith.constant 0xFF800000 : f32
    %7 = vector.broadcast %cst : f32 to vector<8x17xf32>
    %8 = arith.select %6, %0, %7 : vector<8x17xi1>, vector<8x17xf32>
    %c0_i32 = arith.constant 0 : i32
    %9 = arith.cmpi eq, %arg1, %c0_i32 : i32
    %10 = arith.extui %9 : i1 to i32
    %c0_i32_2 = arith.constant 0 : i32
    %11 = arith.cmpi ne, %10, %c0_i32_2 : i32
    scf.if %11 {
      %cst_15 = arith.constant 0xFF800000 : f32
      %31 = vector.broadcast %cst_15 : f32 to vector<8x1xf32>
      %c0_16 = arith.constant 0 : index
      %c0_17 = arith.constant 0 : index
      %32 = vector.load %arg4[%c0_16, %c0_17] : memref<8x1xf32, #tpu.memory_space<vmem>>, vector<8x1xf32>
      tpu.vector_store %arg4[%c0_16, %c0_17], %31 {strides = array<i32>} : memref<8x1xf32, #tpu.memory_space<vmem>>, vector<8x1xf32>,
      %cst_18 = arith.constant 0.000000e+00 : f32
      %33 = vector.broadcast %cst_18 : f32 to vector<8x1xf32>
      %c0_19 = arith.constant 0 : index
      %c0_20 = arith.constant 0 : index
      %34 = vector.load %arg5[%c0_19, %c0_20] : memref<8x1xf32, #tpu.memory_space<vmem>>, vector<8x1xf32>
      tpu.vector_store %arg5[%c0_19, %c0_20], %33 {strides = array<i32>} : memref<8x1xf32, #tpu.memory_space<vmem>>, vector<8x1xf32>,
      %35 = vector.extract_strided_slice %8 {offsets = [0, 0], sizes = [8, 1], strides = [1, 1]} : vector<8x17xf32> to vector<8x1xf32>
      %c0_21 = arith.constant 0 : index
      %c0_22 = arith.constant 0 : index
      %36 = vector.load %arg6[%c0_21, %c0_22] : memref<8x1xf32, #tpu.memory_space<vmem>>, vector<8x1xf32>
      tpu.vector_store %arg6[%c0_21, %c0_22], %35 {strides = array<i32>} : memref<8x1xf32, #tpu.memory_space<vmem>>, vector<8x1xf32>,
    } else {
    }
    %c0_3 = arith.constant 0 : index
    %c0_4 = arith.constant 0 : index
    %12 = vector.load %arg4[%c0_3, %c0_4] : memref<8x1xf32, #tpu.memory_space<vmem>>, vector<8x1xf32>
    %cst_5 = arith.constant dense<0xFF800000> : vector<8xf32>
    %13 = vector.multi_reduction <maximumf>, %8, %cst_5 [1] : vector<8x17xf32> to vector<8xf32>
    %14 = vector.shape_cast %13 : vector<8xf32> to vector<8x1xf32>
    %15 = arith.maximumf %12, %14 : vector<8x1xf32>
    %16 = arith.subf %12, %15 : vector<8x1xf32>
    %17 = math.exp %16 : vector<8x1xf32>
    %c0_6 = arith.constant 0 : index
    %c0_7 = arith.constant 0 : index
    %18 = vector.load %arg5[%c0_6, %c0_7] : memref<8x1xf32, #tpu.memory_space<vmem>>, vector<8x1xf32>
    %19 = arith.mulf %17, %18 : vector<8x1xf32>
    %20 = vector.broadcast %15 : vector<8x1xf32> to vector<8x17xf32>
    %21 = arith.subf %8, %20 : vector<8x17xf32>
    %22 = math.exp %21 : vector<8x17xf32>
    %cst_8 = arith.constant dense<0.000000e+00> : vector<8xf32>
    %23 = vector.multi_reduction <add>, %22, %cst_8 [1] : vector<8x17xf32> to vector<8xf32>
    %24 = vector.shape_cast %23 : vector<8xf32> to vector<8x1xf32>
    %25 = arith.addf %19, %24 : vector<8x1xf32>
    %c0_9 = arith.constant 0 : index
    %c0_10 = arith.constant 0 : index
    %26 = vector.load %arg5[%c0_9, %c0_10] : memref<8x1xf32, #tpu.memory_space<vmem>>, vector<8x1xf32>
    tpu.vector_store %arg5[%c0_9, %c0_10], %25 {strides = array<i32>} : memref<8x1xf32, #tpu.memory_space<vmem>>, vector<8x1xf32>,
    %c0_11 = arith.constant 0 : index
    %c0_12 = arith.constant 0 : index
    %27 = vector.load %arg4[%c0_11, %c0_12] : memref<8x1xf32, #tpu.memory_space<vmem>>, vector<8x1xf32>
    tpu.vector_store %arg4[%c0_11, %c0_12], %15 {strides = array<i32>} : memref<8x1xf32, #tpu.memory_space<vmem>>, vector<8x1xf32>,
    %c0_i32_13 = arith.constant 0 : i32
    %28 = arith.cmpi eq, %arg1, %c0_i32_13 : i32
    %29 = arith.extui %28 : i1 to i32
    %c0_i32_14 = arith.constant 0 : i32
    %30 = arith.cmpi ne, %29, %c0_i32_14 : i32
    scf.if %30 {
      %c0_15 = arith.constant 0 : index
      %c0_16 = arith.constant 0 : index
      %31 = vector.load %arg4[%c0_15, %c0_16] : memref<8x1xf32, #tpu.memory_space<vmem>>, vector<8x1xf32>
      %c0_17 = arith.constant 0 : index
      %c0_18 = arith.constant 0 : index
      %32 = vector.load %arg5[%c0_17, %c0_18] : memref<8x1xf32, #tpu.memory_space<vmem>>, vector<8x1xf32>
      %33 = math.log %32 : vector<8x1xf32>
      %34 = arith.addf %31, %33 : vector<8x1xf32>
      %c0_19 = arith.constant 0 : index
      %c0_20 = arith.constant 0 : index
      %35 = vector.load %arg6[%c0_19, %c0_20] : memref<8x1xf32, #tpu.memory_space<vmem>>, vector<8x1xf32>
      %36 = arith.subf %34, %35 : vector<8x1xf32>
      %c0_21 = arith.constant 0 : index
      %c0_22 = arith.constant 0 : index
      %37 = vector.load %arg3[%c0_21, %c0_22] : memref<8x1xf32, #tpu.memory_space<vmem>>, vector<8x1xf32>
      tpu.vector_store %arg3[%c0_21, %c0_22], %36 {strides = array<i32>} : memref<8x1xf32, #tpu.memory_space<vmem>>, vector<8x1xf32>,
    } else {
    }
    return
  }
  func.func @transform_0(%arg0: i32, %arg1: i32) -> (i32, i32) {
    %c0_i32 = arith.constant 0 : i32
    return %arg0, %arg1 : i32, i32
  }
  func.func @transform_1(%arg0: i32, %arg1: i32) -> (i32, i32) {
    %c0_i32 = arith.constant 0 : i32
    %c0_i32_0 = arith.constant 0 : i32
    return %arg0, %c0_i32 : i32, i32
  }
}

</mosaic_0001>

<bundles_post_ra>
// kernel: tpu_custom_call.1
= control target key start
LH: loop header
LB: loop body
LE: loop exit
PB: predicated region body
PF: predicated region fallthrough
CT: control target
= control target key end

     0   :  { %6 = vsyncpa [#allocation6], 0  ;;  %s111_s6 = smov [#allocation5]   ;;  %s139_s0 = inlined_call_operand.hbm [shape: f32[8,17], index: 0, kind: input, shape index: {}]   ;;  %s140_s1 = inlined_call_operand.vmem [shape: f32[8,1], index: 1, kind: output, shape index: {}]  }
   0x1   :  { %s13_s7 = sshll.u32 %s111_s6, 4  ;;  %s14_s7 = int_to_ptr.vmem [resolvable:$true] %s13_s7 }
   0x2   :  { %s97_s8 = scalar_lea.vmem %s14_s7, 128  ;;  %p102_p1 = scmp.lt.s32.totalorder %s14_s7, %s14_s7 }
   0x3   :  { %p98_p0 = scmp.ne.s32.totalorder %s14_s7, %s97_s8  ;;  %p103_p2 = scmp.lt.s32.totalorder %s97_s8, %s97_s8 }
   0x5   :  { %p104_p3 = por %p103_p2, %p102_p1 }
   0x7   :  { %p105_p4 = pnand %p104_p3, %p98_p0 }
   0x9   :  { %108 = shalt.err (!%p105_p4)
}
   0xa   :  { %16 = dma.hbm_to_vmem [thread:$0]  %s139_s0, 128, %s14_s7, [#allocation6]  }
   0xb   :  { %109 = dma.done.wait [#allocation6], 128  }
   0xc   :  { %110 = vsyncadd [#allocation6], 4294967168  ;;  %v21_v0 = vlaneseq  ;;  %vm32_vm0 = vcmask 7168   ;;  %v112_v1 = vmov -inf   ;;  %vm37_vm2 = vcmask 138240   ;;  %v20_v3 = vld [vmem:[#allocation5] sm:$0xff] }
   0xd   :  { %33 = vst.msk [vmem:[#allocation2] sm:$0xff] %vm32_vm0, %v112_v1  ;;  %v113_v6 = vmov 0   ;;  %v114_v7 = vmov 0.0  }
   0xe   :  { %v22_v2 = vand.u32 127, %v21_v0  ;;  %82 = vset.pattern.permute.xlu0 %v113_v6  ;;  %34 = vst.msk [vmem:[#allocation3] sm:$0xff] %vm32_vm0, %v114_v7 }
  0x10   :  { %vm26_vm1 = vcmp.lt.s32.totalorder %v22_v2, 17 }
  0x11   :  { %v27_v4 = vsel %vm26_vm1, %v20_v3, -inf }
  0x12   :  { %v38_v5 = vsel %vm37_vm2, %v27_v4, -inf  ;;  %35 = vst.msk [vmem:[#allocation4] sm:$0xff] %vm32_vm0, %v27_v4 }
  0x13   :  { %39 = vmax.xlane.f32.xlu0 %v38_v5 }
  0x14   :  { %v36_v8 = vld [vmem:[#allocation2] sm:$0xff] }
  0x15   :  { %v45_v19 = vld [vmem:[#allocation3] sm:$0xff] }
  0x19   :  { %v70_v26 = vld [vmem:[#allocation4] sm:$0xff] }
  0x9c   :  { %v40_v9 = vpop.xlane.xlu0 %39 }
  0x9d   :  { %v41_v10 = vmax.f32 %v36_v8, %v40_v9 }
  0x9f   :  { %v42_v11 = vsub.f32 %v36_v8, %v41_v10  ;;  %61 = vst.msk [vmem:[#allocation2] sm:$0xff] %vm32_vm0, %v41_v10  ;;  %49 = vperm.xlu0 %82, %v41_v10  }
  0xa1   :  { %v43_v17 = vmul.f32 1.442695, %v42_v11 }
  0xa6   :  { %v65_v27 = vld [vmem:[#allocation2] sm:$0xff] }
 0x11a   :  { %v50_v12 = vpop.permute.xlu0 %49 }
 0x11b   :  { %v52_v13 = vsub.f32 %v27_v4, %v50_v12 }
 0x11d   :  { %v53_v14 = vmul.f32 1.442695, %v52_v13 }
 0x11f   :  { %83 = vpow2.f32 %v53_v14 }
 0x120   :  { %85 = vpow2.f32 %v43_v17 }
 0x12c   :  { %v84_v15 = vpop.eup %83 }
 0x12d   :  { %v55_v16 = vsel %vm37_vm2, %v84_v15, 0.0  ;;  %v86_v18 = vpop.eup %85 }
 0x12e   :  { %56 = vadd.xlane.f32.xlu1 %v55_v16  ;;  %v46_v20 = vmul.f32 %v86_v18, %v45_v19 }
 0x1b7   :  { %v57_v21 = vpop.xlane.xlu1 %56 }
 0x1b8   :  { %v58_v22 = vadd.f32 %v57_v21, %v46_v20 }
 0x1ba   :  { %60 = vst.msk [vmem:[#allocation3] sm:$0xff] %vm32_vm0, %v58_v22 }
 0x1c1   :  { %v66_v23 = vld [vmem:[#allocation3] sm:$0xff] }
 0x1c2   :  { %87 = vlog2.f32 %v66_v23 }
 0x1cf   :  { %v88_v24 = vpop.eup %87 }
 0x1d0   :  { %v68_v25 = vmul.f32 0.6931472, %v88_v24 }
 0x1d2   :  { %v69_v28 = vadd.f32 %v68_v25, %v65_v27 }
 0x1d4   :  { %v71_v29 = vsub.f32 %v69_v28, %v70_v26 }
 0x1d6   :  { %72 = vst.msk [vmem:[%s140_s1] sm:$0xff] %vm32_vm0, %v71_v29 }
 0x1d7   :  { %77 = vsyncpa [#allocation6], 1 }

</bundles_post_ra>
